<compile_context>
chip_gen: v7x
topology: tpu7x:2x2x1
jax: 0.10.0
libtpu: 0.0.40
codegen_flags: <defaults>
</compile_context>

<pallas_src>
import functools

import jax
import jax.numpy as jnp
from jax.experimental import pallas as pl
from jax.experimental.pallas import tpu as pltpu

INPUT_FEATURES = 12
OUTPUT_SIZE = 5
OUT_PAD = 128          # lane-dense padded output width (one full vreg lane row)
MAX_BLOCK_ROWS = 2048  # batch-tile cap (keeps VMEM use small on all gens)


def linear_kernel(x_ref, wt_ref, b_ref, o_ref):
    # x_ref: (TB, F)  wt_ref: (F, OUT_PAD)  b_ref: (1, OUT_PAD)  o_ref: (TB, OUT_PAD)
    x = x_ref[...]
    wt = wt_ref[...]
    b = b_ref[...]
    f = x.shape[1]
    # VPU broadcast-multiply-accumulate over the tiny K dim (skip the MXU):
    # 12 fused multiply-adds per output column, fully unrolled at trace time.
    acc = b + x[:, 0:1] * wt[0:1, :]
    for k in range(1, f):
        acc = acc + x[:, k:k + 1] * wt[k:k + 1, :]
    o_ref[...] = acc.astype(o_ref.dtype)


def prepare_params(weight, bias):
    """One-time parameter layout prep (hoisted out of the forward hot path).

    weight: (O, F) torch.nn.Linear layout -> (F, OUT_PAD) zero-padded, lane-dense
    bias:   (O,)                          -> (1, OUT_PAD) zero-padded
    """
    o, f = weight.shape
    wt_padded = jnp.zeros((f, OUT_PAD), weight.dtype).at[:, :o].set(weight.T)
    b_padded = jnp.zeros((1, OUT_PAD), bias.dtype).at[0, :o].set(bias)
    return wt_padded, b_padded


@functools.partial(jax.jit, static_argnames=("out_features", "block_rows"))
def _forward_impl(x, wt_padded, b_padded, out_features, block_rows):
    # Mirror x.view(-1, x.size(1)) (no-op for 2-D input).
    x = x.reshape(-1, x.shape[1])
    B, F = x.shape

    # Pick a batch tile: multiple of 8, bounded; pad B up to a tile multiple.
    TB = min(block_rows, ((B + 7) // 8) * 8)
    TB = ((TB + 7) // 8) * 8
    Bp = ((B + TB - 1) // TB) * TB
    if Bp != B:
        x = jnp.pad(x, ((0, Bp - B), (0, 0)))

    grid = (Bp // TB,)
    cost = pl.CostEstimate(
        flops=2 * Bp * F * OUT_PAD,
        transcendentals=0,
        bytes_accessed=Bp * F * 4 + F * OUT_PAD * 4 + OUT_PAD * 4
        + Bp * OUT_PAD * 4,
    )

    out = pl.pallas_call(
        linear_kernel,
        out_shape=jax.ShapeDtypeStruct((Bp, OUT_PAD), x.dtype),
        grid=grid,
        in_specs=[
            pl.BlockSpec((TB, F), lambda i: (i, 0)),          # batch-tiled x
            pl.BlockSpec((F, OUT_PAD), lambda i: (0, 0)),     # resident weights
            pl.BlockSpec((1, OUT_PAD), lambda i: (0, 0)),     # resident bias
        ],
        out_specs=pl.BlockSpec((TB, OUT_PAD), lambda i: (i, 0)),
        compiler_params=pltpu.CompilerParams(
            dimension_semantics=("parallel",)),               # 2 TCs on v7x
        cost_estimate=cost,
    )(x, wt_padded, b_padded)

    # Drop batch padding + lane padding; mirrors output.view(-1, output_size).
    return out[:B, :out_features].reshape(-1, out_features)


def small_model_forward(x, wt_padded, b_padded, out_features=OUTPUT_SIZE,
                        block_rows=MAX_BLOCK_ROWS):
    """Equivalent of SmallModel.forward: o = x @ W.T + b (then view(-1, O))."""
    return _forward_impl(x, wt_padded, b_padded, out_features, block_rows)


if __name__ == "__main__":
    key = jax.random.PRNGKey(0)
    kx, kw, kb, kx2 = jax.random.split(key, 4)

    # Deterministic parameter init (torch.nn.Linear-style uniform bound).
    bound = 1.0 / (INPUT_FEATURES ** 0.5)
    weight = jax.random.uniform(
        kw, (OUTPUT_SIZE, INPUT_FEATURES), minval=-bound, maxval=bound,
        dtype=jnp.float32)
    bias = jax.random.uniform(
        kb, (OUTPUT_SIZE,), minval=-bound, maxval=bound, dtype=jnp.float32)

    # One-time layout prep (not in the per-call hot path).
    wt_padded, b_padded = prepare_params(weight, bias)

    # Small primary test (batch=8).
    batch = 8
    x = jax.random.normal(kx, (batch, INPUT_FEATURES), dtype=jnp.float32)
    out = small_model_forward(x, wt_padded, b_padded)
    out = jax.block_until_ready(out)
    ref = x @ weight.T + bias
    assert out.shape == (batch, OUTPUT_SIZE), out.shape
    assert jnp.allclose(out, ref, atol=1e-5, rtol=1e-5)

    # Secondary test exercising multi-step batch tiling + padding (non-multiple B).
    batch2 = 2003
    x2 = jax.random.normal(kx2, (batch2, INPUT_FEATURES), dtype=jnp.float32)
    out2 = small_model_forward(x2, wt_padded, b_padded, block_rows=512)
    out2 = jax.block_until_ready(out2)
    ref2 = x2 @ weight.T + bias
    assert out2.shape == (batch2, OUTPUT_SIZE), out2.shape
    assert jnp.allclose(out2, ref2, atol=1e-5, rtol=1e-5)

    # Repeated-invocation check (the original script calls forward many times):
    # jitted wrapper reuses the compiled executable across calls.
    out3 = jax.block_until_ready(small_model_forward(x, wt_padded, b_padded))
    assert jnp.allclose(out3, ref, atol=1e-5, rtol=1e-5)

    print("KERNEL_OK")
</pallas_src>

<mosaic_0001>
module attributes {stable_mosaic.version = 11 : i64} {
  func.func @linear_kernel(%arg0: i32, %arg1: memref<8x12xf32, #tpu.memory_space<vmem>>, %arg2: memref<12x128xf32, #tpu.memory_space<vmem>>, %arg3: memref<1x128xf32, #tpu.memory_space<vmem>>, %arg4: memref<8x128xf32, #tpu.memory_space<vmem>>) attributes {dimension_semantics = [#tpu.dimension_semantics<parallel>], iteration_bounds = array<i64: 1>, scalar_prefetch = 0 : i64, scratch_operands = 0 : i64, tpu.core_type = #tpu.core_type<tc>, window_params = [{transform_indices = @transform_0, window_bounds = array<i64: 8, 12>}, {pipeline_mode = #tpu.pipeline_mode<synchronous>, transform_indices = @transform_1, window_bounds = array<i64: 12, 128>}, {pipeline_mode = #tpu.pipeline_mode<synchronous>, transform_indices = @transform_2, window_bounds = array<i64: 1, 128>}, {transform_indices = @transform_3, window_bounds = array<i64: 8, 128>}]} {
    %c0 = arith.constant 0 : index
    %c0_0 = arith.constant 0 : index
    %0 = vector.load %arg1[%c0, %c0_0] : memref<8x12xf32, #tpu.memory_space<vmem>>, vector<8x12xf32>
    %c0_1 = arith.constant 0 : index
    %c0_2 = arith.constant 0 : index
    %1 = vector.load %arg2[%c0_1, %c0_2] : memref<12x128xf32, #tpu.memory_space<vmem>>, vector<12x128xf32>
    %c0_3 = arith.constant 0 : index
    %c0_4 = arith.constant 0 : index
    %2 = vector.load %arg3[%c0_3, %c0_4] : memref<1x128xf32, #tpu.memory_space<vmem>>, vector<1x128xf32>
    %3 = vector.extract_strided_slice %0 {offsets = [0, 0], sizes = [8, 1], strides = [1, 1]} : vector<8x12xf32> to vector<8x1xf32>
    %4 = vector.extract_strided_slice %1 {offsets = [0, 0], sizes = [1, 128], strides = [1, 1]} : vector<12x128xf32> to vector<1x128xf32>
    %5 = vector.broadcast %3 : vector<8x1xf32> to vector<8x128xf32>
    %6 = vector.broadcast %4 : vector<1x128xf32> to vector<8x128xf32>
    %7 = arith.mulf %5, %6 : vector<8x128xf32>
    %8 = vector.broadcast %2 : vector<1x128xf32> to vector<8x128xf32>
    %9 = arith.addf %8, %7 : vector<8x128xf32>
    %10 = vector.extract_strided_slice %0 {offsets = [0, 1], sizes = [8, 1], strides = [1, 1]} : vector<8x12xf32> to vector<8x1xf32>
    %11 = vector.extract_strided_slice %1 {offsets = [1, 0], sizes = [1, 128], strides = [1, 1]} : vector<12x128xf32> to vector<1x128xf32>
    %12 = vector.broadcast %10 : vector<8x1xf32> to vector<8x128xf32>
    %13 = vector.broadcast %11 : vector<1x128xf32> to vector<8x128xf32>
    %14 = arith.mulf %12, %13 : vector<8x128xf32>
    %15 = arith.addf %9, %14 : vector<8x128xf32>
    %16 = vector.extract_strided_slice %0 {offsets = [0, 2], sizes = [8, 1], strides = [1, 1]} : vector<8x12xf32> to vector<8x1xf32>
    %17 = vector.extract_strided_slice %1 {offsets = [2, 0], sizes = [1, 128], strides = [1, 1]} : vector<12x128xf32> to vector<1x128xf32>
    %18 = vector.broadcast %16 : vector<8x1xf32> to vector<8x128xf32>
    %19 = vector.broadcast %17 : vector<1x128xf32> to vector<8x128xf32>
    %20 = arith.mulf %18, %19 : vector<8x128xf32>
    %21 = arith.addf %15, %20 : vector<8x128xf32>
    %22 = vector.extract_strided_slice %0 {offsets = [0, 3], sizes = [8, 1], strides = [1, 1]} : vector<8x12xf32> to vector<8x1xf32>
    %23 = vector.extract_strided_slice %1 {offsets = [3, 0], sizes = [1, 128], strides = [1, 1]} : vector<12x128xf32> to vector<1x128xf32>
    %24 = vector.broadcast %22 : vector<8x1xf32> to vector<8x128xf32>
    %25 = vector.broadcast %23 : vector<1x128xf32> to vector<8x128xf32>
    %26 = arith.mulf %24, %25 : vector<8x128xf32>
    %27 = arith.addf %21, %26 : vector<8x128xf32>
    %28 = vector.extract_strided_slice %0 {offsets = [0, 4], sizes = [8, 1], strides = [1, 1]} : vector<8x12xf32> to vector<8x1xf32>
    %29 = vector.extract_strided_slice %1 {offsets = [4, 0], sizes = [1, 128], strides = [1, 1]} : vector<12x128xf32> to vector<1x128xf32>
    %30 = vector.broadcast %28 : vector<8x1xf32> to vector<8x128xf32>
    %31 = vector.broadcast %29 : vector<1x128xf32> to vector<8x128xf32>
    %32 = arith.mulf %30, %31 : vector<8x128xf32>
    %33 = arith.addf %27, %32 : vector<8x128xf32>
    %34 = vector.extract_strided_slice %0 {offsets = [0, 5], sizes = [8, 1], strides = [1, 1]} : vector<8x12xf32> to vector<8x1xf32>
    %35 = vector.extract_strided_slice %1 {offsets = [5, 0], sizes = [1, 128], strides = [1, 1]} : vector<12x128xf32> to vector<1x128xf32>
    %36 = vector.broadcast %34 : vector<8x1xf32> to vector<8x128xf32>
    %37 = vector.broadcast %35 : vector<1x128xf32> to vector<8x128xf32>
    %38 = arith.mulf %36, %37 : vector<8x128xf32>
    %39 = arith.addf %33, %38 : vector<8x128xf32>
    %40 = vector.extract_strided_slice %0 {offsets = [0, 6], sizes = [8, 1], strides = [1, 1]} : vector<8x12xf32> to vector<8x1xf32>
    %41 = vector.extract_strided_slice %1 {offsets = [6, 0], sizes = [1, 128], strides = [1, 1]} : vector<12x128xf32> to vector<1x128xf32>
    %42 = vector.broadcast %40 : vector<8x1xf32> to vector<8x128xf32>
    %43 = vector.broadcast %41 : vector<1x128xf32> to vector<8x128xf32>
    %44 = arith.mulf %42, %43 : vector<8x128xf32>
    %45 = arith.addf %39, %44 : vector<8x128xf32>
    %46 = vector.extract_strided_slice %0 {offsets = [0, 7], sizes = [8, 1], strides = [1, 1]} : vector<8x12xf32> to vector<8x1xf32>
    %47 = vector.extract_strided_slice %1 {offsets = [7, 0], sizes = [1, 128], strides = [1, 1]} : vector<12x128xf32> to vector<1x128xf32>
    %48 = vector.broadcast %46 : vector<8x1xf32> to vector<8x128xf32>
    %49 = vector.broadcast %47 : vector<1x128xf32> to vector<8x128xf32>
    %50 = arith.mulf %48, %49 : vector<8x128xf32>
    %51 = arith.addf %45, %50 : vector<8x128xf32>
    %52 = vector.extract_strided_slice %0 {offsets = [0, 8], sizes = [8, 1], strides = [1, 1]} : vector<8x12xf32> to vector<8x1xf32>
    %53 = vector.extract_strided_slice %1 {offsets = [8, 0], sizes = [1, 128], strides = [1, 1]} : vector<12x128xf32> to vector<1x128xf32>
    %54 = vector.broadcast %52 : vector<8x1xf32> to vector<8x128xf32>
    %55 = vector.broadcast %53 : vector<1x128xf32> to vector<8x128xf32>
    %56 = arith.mulf %54, %55 : vector<8x128xf32>
    %57 = arith.addf %51, %56 : vector<8x128xf32>
    %58 = vector.extract_strided_slice %0 {offsets = [0, 9], sizes = [8, 1], strides = [1, 1]} : vector<8x12xf32> to vector<8x1xf32>
    %59 = vector.extract_strided_slice %1 {offsets = [9, 0], sizes = [1, 128], strides = [1, 1]} : vector<12x128xf32> to vector<1x128xf32>
    %60 = vector.broadcast %58 : vector<8x1xf32> to vector<8x128xf32>
    %61 = vector.broadcast %59 : vector<1x128xf32> to vector<8x128xf32>
    %62 = arith.mulf %60, %61 : vector<8x128xf32>
    %63 = arith.addf %57, %62 : vector<8x128xf32>
    %64 = vector.extract_strided_slice %0 {offsets = [0, 10], sizes = [8, 1], strides = [1, 1]} : vector<8x12xf32> to vector<8x1xf32>
    %65 = vector.extract_strided_slice %1 {offsets = [10, 0], sizes = [1, 128], strides = [1, 1]} : vector<12x128xf32> to vector<1x128xf32>
    %66 = vector.broadcast %64 : vector<8x1xf32> to vector<8x128xf32>
    %67 = vector.broadcast %65 : vector<1x128xf32> to vector<8x128xf32>
    %68 = arith.mulf %66, %67 : vector<8x128xf32>
    %69 = arith.addf %63, %68 : vector<8x128xf32>
    %70 = vector.extract_strided_slice %0 {offsets = [0, 11], sizes = [8, 1], strides = [1, 1]} : vector<8x12xf32> to vector<8x1xf32>
    %71 = vector.extract_strided_slice %1 {offsets = [11, 0], sizes = [1, 128], strides = [1, 1]} : vector<12x128xf32> to vector<1x128xf32>
    %72 = vector.broadcast %70 : vector<8x1xf32> to vector<8x128xf32>
    %73 = vector.broadcast %71 : vector<1x128xf32> to vector<8x128xf32>
    %74 = arith.mulf %72, %73 : vector<8x128xf32>
    %75 = arith.addf %69, %74 : vector<8x128xf32>
    %c0_5 = arith.constant 0 : index
    %c0_6 = arith.constant 0 : index
    %76 = vector.load %arg4[%c0_5, %c0_6] : memref<8x128xf32, #tpu.memory_space<vmem>>, vector<8x128xf32>
    tpu.vector_store %arg4[%c0_5, %c0_6], %75 {strides = array<i32>} : memref<8x128xf32, #tpu.memory_space<vmem>>, vector<8x128xf32>,
    return
  }
  func.func @transform_0(%arg0: i32) -> (i32, i32) {
    %c0_i32 = arith.constant 0 : i32
    %c0_i32_0 = arith.constant 0 : i32
    return %arg0, %c0_i32 : i32, i32
  }
  func.func @transform_1(%arg0: i32) -> (i32, i32) {
    %c0_i32 = arith.constant 0 : i32
    %c0_i32_0 = arith.constant 0 : i32
    %c0_i32_1 = arith.constant 0 : i32
    return %c0_i32, %c0_i32_0 : i32, i32
  }
  func.func @transform_2(%arg0: i32) -> (i32, i32) {
    %c0_i32 = arith.constant 0 : i32
    %c0_i32_0 = arith.constant 0 : i32
    %c0_i32_1 = arith.constant 0 : i32
    return %c0_i32, %c0_i32_0 : i32, i32
  }
  func.func @transform_3(%arg0: i32) -> (i32, i32) {
    %c0_i32 = arith.constant 0 : i32
    %c0_i32_0 = arith.constant 0 : i32
    return %arg0, %c0_i32 : i32, i32
  }
}

</mosaic_0001>

<bundles_post_ra>
// kernel: _forward_impl.1
= control target key start
LH: loop header
LB: loop body
LE: loop exit
PB: predicated region body
PF: predicated region fallthrough
CT: control target
= control target key end

     0   :  { %8 = vsyncpa [#allocation3], 0  ;;  %s374_s0 = inlined_call_operand.hbm [shape: f32[8,12], index: 0, kind: input, shape index: {}]   ;;  %s375_s1 = inlined_call_operand.hbm [shape: f32[12,128], index: 1, kind: input, shape index: {}]   ;;  %s376_s2 = inlined_call_operand.vmem [shape: f32[1,128], index: 2, kind: input, shape index: {}]   ;;  %s377_s3 = inlined_call_operand.hbm [shape: f32[8,128], index: 3, kind: output, shape index: {}]  }
   0x1   :  { %9 = vsyncpa [#allocation6], 0 }
   0x2   :  { %10 = vsyncpa [#allocation4], 0  ;;  %s291_s12 = smov [#allocation2]   ;;  %s292_s14 = smov [#allocation5]  }
   0x3   :  { %s17_s13 = sshll.u32 %s291_s12, 4  ;;  %s26_s15 = sshll.u32 %s292_s14, 4  ;;  %s18_s13 = int_to_ptr.vmem [resolvable:$true] %s17_s13  ;;  %s328_s15 = int_to_ptr.vmem [resolvable:$true] %s26_s15 }
   0x4   :  { %s219_s18 = scalar_lea.hbm %s374_s0, 128 }
   0x5   :  { %p220_p0 = scmp.ne.s32.totalorder %s374_s0, %s219_s18  ;;  %p223_p1 = scmp.lt.u32.totalorder %s219_s18, %s374_s0 }
   0x7   :  { %p225_p2 = pnand %p223_p1, %p220_p0 }
   0x9   :  { %228 = shalt.err (!%p225_p2)
}
   0xa   :  { %s229_s23 = scalar_lea.vmem %s18_s13, 128  ;;  %p234_p4 = scmp.lt.s32.totalorder %s18_s13, %s18_s13 }
   0xb   :  { %p230_p3 = scmp.ne.s32.totalorder %s18_s13, %s229_s23  ;;  %p235_p5 = scmp.lt.s32.totalorder %s229_s23, %s229_s23 }
   0xd   :  { %p236_p6 = por %p235_p5, %p234_p4 }
   0xf   :  { %p237_p7 = pnand %p236_p6, %p230_p3 }
  0x11   :  { %240 = shalt.err (!%p237_p7)
}
  0x12   :  { %20 = dma.hbm_to_vmem [thread:$0]  %s374_s0, 128, %s18_s13, [#allocation3]  }
  0x13   :  { %s241_s28 = scalar_lea.hbm %s375_s1, 256 }
  0x14   :  { %p242_p8 = scmp.ne.s32.totalorder %s375_s1, %s241_s28  ;;  %p245_p9 = scmp.lt.u32.totalorder %s241_s28, %s375_s1 }
  0x16   :  { %p247_p10 = pnand %p245_p9, %p242_p8 }
  0x18   :  { %250 = shalt.err (!%p247_p10)
}
  0x19   :  { %s251_s6 = scalar_lea.vmem %s328_s15, 256  ;;  %p256_p12 = scmp.lt.s32.totalorder %s328_s15, %s328_s15 }
  0x1a   :  { %p252_p11 = scmp.ne.s32.totalorder %s328_s15, %s251_s6  ;;  %p257_p13 = scmp.lt.s32.totalorder %s251_s6, %s251_s6 }
  0x1c   :  { %p258_p0 = por %p257_p13, %p256_p12 }
  0x1e   :  { %p259_p1 = pnand %p258_p0, %p252_p11 }
  0x20   :  { %262 = shalt.err (!%p259_p1)
}
  0x21   :  { %s293_s0 = smov 128   ;;  %s294_s7 = smov 8  }
  0x22   :  { %32 = dma.hbm_to_vmem [thread:$0]  %s375_s1, 256, %s328_s15, [#allocation6], %s293_s0, %s293_s0, %s294_s7  }
  0x23   :  { %285 = dma.done.wait [#allocation3], 128  }
  0x24   :  { %286 = vsyncadd [#allocation3], 4294967168 }
  0x25   :  { %287 = dma.done.wait [#allocation6], 256  }
  0x26   :  { %288 = vsyncadd [#allocation6], 4294967040  ;;  %v295_v0 = vmov 2   ;;  %v296_v1 = vmov 0   ;;  %v41_v2 = vld [vmem:[#allocation2] sm:$0xff]  ;;  %v297_v3 = vmov 3   ;;  %v50_v13 = vlaneseq }
  0x27   :  { %209 = vset.pattern.permute.xlu1 %v295_v0  ;;  %207 = vset.pattern.permute.xlu0 %v296_v1  ;;  %v298_v4 = vmov 1   ;;  %v299_v5 = vmov 4   ;;  %v300_v6 = vmov 5   ;;  %v301_v7 = vmov 6   ;;  %v42_v16 = vld [vmem:[#allocation5] sm:$0xff] }
  0x28   :  { %73 = vperm.xlu1 %209, %v41_v2   ;;  %47 = vperm.xlu0 %207, %v41_v2   ;;  %v302_v8 = vmov 8   ;;  %v303_v9 = vmov 7   ;;  %v304_v10 = vmov 11   ;;  %v305_v11 = vmov 9   ;;  %v189_v22 = vld [vmem:[%s376_s2] ss:$0 sm:$0xff] }
  0x29   :  { %v306_v12 = vmov 10   ;;  %v51_v14 = vshrl.u32 %v50_v13, 7  ;;  %v43_v50 = vld [vmem:[#allocation5 + $0x8] sm:$0xf]  ;;  %s307_s2 = smov [#allocation7]  }
  0x2a   :  { %s179_s11 = sshll.u32 %s307_s2, 4  ;;  %s180_s11 = int_to_ptr.vmem [resolvable:$true] %s179_s11 }
  0x2b   :  { %v52_v15 = vsub.s32 0, %v51_v14  ;;  %v68_v18 = vsub.s32 1, %v51_v14  ;;  %v78_v19 = vsub.s32 2, %v51_v14  ;;  %v88_v24 = vsub.s32 3, %v51_v14  ;;  %s263_s12 = scalar_lea.vmem %s180_s11, 128  ;;  %p268_p3 = scmp.lt.s32.totalorder %s180_s11, %s180_s11 }
  0x2c   :  { %210 = vset.pattern.permute.xlu1 %v297_v3  ;;  %208 = vset.pattern.permute.xlu0 %v298_v4  ;;  %v98_v26 = vsub.s32 4, %v51_v14  ;;  %v108_v31 = vsub.s32 5, %v51_v14  ;;  %v118_v38 = vsub.s32 6, %v51_v14  ;;  %v128_v47 = vsub.s32 7, %v51_v14  ;;  %p264_p2 = scmp.ne.s32.totalorder %s180_s11, %s263_s12  ;;  %p269_p4 = scmp.lt.s32.totalorder %s263_s12, %s263_s12 }
  0x2d   :  { %83 = vperm.xlu1 %210, %v41_v2   ;;  %63 = vperm.xlu0 %208, %v41_v2   ;;  %v53_v17 = vrot.slane %v42_v16, %v52_v15  ;;  %v69_v25 = vrot.slane %v42_v16, %v68_v18  ;;  %v79_v27 = vrot.slane %v42_v16, %v78_v19 }
  0x2e   :  { %v89_v32 = vrot.slane %v42_v16, %v88_v24  ;;  %v99_v34 = vrot.slane %v42_v16, %v98_v26  ;;  %v109_v37 = vrot.slane %v42_v16, %v108_v31  ;;  %v119_v46 = vrot.slane %v42_v16, %v118_v38  ;;  %p270_p5 = por %p269_p4, %p268_p3 }
  0x2f   :  { %v129_v53 = vrot.slane %v42_v16, %v128_v47  ;;  %v139_v54 = vrot.slane %v43_v50, %v52_v15  ;;  %v149_v61 = vrot.slane %v43_v50, %v68_v18  ;;  %v159_v1 = vrot.slane %v43_v50, %v78_v19 }
  0x30   :  { %p271_p6 = pnand %p270_p5, %p264_p2 }
  0x31   :  { %211 = vset.pattern.permute.xlu1 %v299_v5  ;;  %212 = vset.pattern.permute.xlu0 %v300_v6 }
  0x32   :  { %93 = vperm.xlu1 %211, %v41_v2   ;;  %103 = vperm.xlu0 %212, %v41_v2  }
  0x36   :  { %213 = vset.pattern.permute.xlu1 %v301_v7  ;;  %215 = vset.pattern.permute.xlu0 %v302_v8 }
  0x37   :  { %113 = vperm.xlu1 %213, %v41_v2   ;;  %133 = vperm.xlu0 %215, %v41_v2  }
  0x3b   :  { %214 = vset.pattern.permute.xlu1 %v303_v9  ;;  %218 = vset.pattern.permute.xlu0 %v304_v10 }
  0x3c   :  { %123 = vperm.xlu1 %214, %v41_v2   ;;  %163 = vperm.xlu0 %218, %v41_v2  }
  0x40   :  { %216 = vset.pattern.permute.xlu1 %v305_v11 }
  0x41   :  { %143 = vperm.xlu1 %216, %v41_v2  }
  0x45   :  { %217 = vset.pattern.permute.xlu1 %v306_v12 }
  0x46   :  { %153 = vperm.xlu1 %217, %v41_v2   ;;  %v169_v2 = vrot.slane %v43_v50, %v88_v24 }
  0xa7   :  { %v74_v20 = vpop.permute.xlu1 %73  ;;  %v48_v21 = vpop.permute.xlu0 %47 }
  0xa8   :  { %v54_v23 = vmul.f32 %v53_v17, %v48_v21  ;;  %v80_v35 = vmul.f32 %v79_v27, %v74_v20 }
  0xaa   :  { %v61_v28 = vadd.f32 %v189_v22, %v54_v23 }
  0xac   :  { %v84_v29 = vpop.permute.xlu1 %83  ;;  %v64_v30 = vpop.permute.xlu0 %63 }
  0xad   :  { %v70_v33 = vmul.f32 %v69_v25, %v64_v30  ;;  %v90_v39 = vmul.f32 %v89_v32, %v84_v29 }
  0xaf   :  { %v71_v36 = vadd.f32 %v70_v33, %v61_v28 }
  0xb1   :  { %v81_v40 = vadd.f32 %v80_v35, %v71_v36  ;;  %v94_v41 = vpop.permute.xlu1 %93  ;;  %v104_v42 = vpop.permute.xlu0 %103 }
  0xb2   :  { %v100_v43 = vmul.f32 %v99_v34, %v94_v41  ;;  %v110_v45 = vmul.f32 %v109_v37, %v104_v42 }
  0xb3   :  { %v91_v44 = vadd.f32 %v90_v39, %v81_v40 }
  0xb5   :  { %v101_v48 = vadd.f32 %v100_v43, %v91_v44 }
  0xb6   :  { %v114_v49 = vpop.permute.xlu1 %113  ;;  %v134_v56 = vpop.permute.xlu0 %133 }
  0xb7   :  { %v111_v51 = vadd.f32 %v110_v45, %v101_v48  ;;  %v120_v52 = vmul.f32 %v119_v46, %v114_v49  ;;  %v140_v60 = vmul.f32 %v139_v54, %v134_v56 }
  0xb9   :  { %v121_v57 = vadd.f32 %v120_v52, %v111_v51 }
  0xbb   :  { %v124_v55 = vpop.permute.xlu1 %123  ;;  %v164_v3 = vpop.permute.xlu0 %163 }
  0xbc   :  { %v130_v58 = vmul.f32 %v129_v53, %v124_v55  ;;  %v170_v7 = vmul.f32 %v169_v2, %v164_v3 }
  0xbe   :  { %v131_v59 = vadd.f32 %v130_v58, %v121_v57 }
  0xc0   :  { %v144_v62 = vpop.permute.xlu1 %143  ;;  %v141_v63 = vadd.f32 %v140_v60, %v131_v59 }
  0xc1   :  { %v150_v0 = vmul.f32 %v149_v61, %v144_v62 }
  0xc3   :  { %v151_v5 = vadd.f32 %v150_v0, %v141_v63 }
  0xc5   :  { %v154_v4 = vpop.permute.xlu1 %153 }
  0xc6   :  { %v160_v6 = vmul.f32 %v159_v1, %v154_v4 }
  0xc8   :  { %v161_v8 = vadd.f32 %v160_v6, %v151_v5 }
  0xca   :  { %v171_v9 = vadd.f32 %v170_v7, %v161_v8 }
  0xcc   :  { %172 = vst [vmem:[#allocation7] sm:$0xff] %v171_v9 }
  0xcd   :  { %274 = shalt.err (!%p271_p6)
}
  0xce   :  { %s275_s15 = scalar_lea.hbm %s377_s3, 128 }
  0xcf   :  { %p276_p7 = scmp.ne.s32.totalorder %s377_s3, %s275_s15  ;;  %p279_p8 = scmp.lt.u32.totalorder %s275_s15, %s377_s3 }
  0xd1   :  { %p281_p9 = pnand %p279_p8, %p276_p7 }
  0xd3   :  { %284 = shalt.err (!%p281_p9)
}
  0xd4   :  { %182 = dma.vmem_to_hbm [thread:$0]  %s180_s11, 128, %s377_s3, [#allocation4]  }
  0xd5   :  { %289 = dma.done.wait [#allocation4], 128  }
  0xd6   :  { %290 = vsyncadd [#allocation4], 4294967168 }
  0xd7   :  { %186 = vsyncpa [#allocation3], 1 }
  0xd8   :  { %187 = vsyncpa [#allocation6], 1 }
  0xd9   :  { %188 = vsyncpa [#allocation4], 1 }

</bundles_post_ra>
